<compile_context>
chip_gen: v7x
topology: tpu7x:2x2x1
jax: 0.10.0
libtpu: 0.0.40
codegen_flags: <defaults>
</compile_context>

<pallas_src>
import functools

import jax
import jax.numpy as jnp
from jax import lax
from jax.experimental import pallas as pl
from jax.experimental.pallas import tpu as pltpu


_TARGET_BLOCK_BYTES = 4 << 20     # per pipeline buffer, f32-equivalent
_VMEM_LIMIT_CAP = 48 << 20        # safe scoped limit on v7x's 64 MiB VMEM
_MIN_GRID_STEPS = 8               # megacore sharding + pipelining


def _adain_kernel(c_ref, s_ref, o_ref, *, eps: float, hw: int):
    """One tile of rows: each row is one (n, c) instance of length H*W."""
    c = c_ref[...].astype(jnp.float32)
    s = s_ref[...].astype(jnp.float32)

    inv_hw = jnp.float32(1.0 / hw)
    # Unbiased variance (torch.var default, ddof=1).  torch returns NaN for a
    # single spatial element; we intentionally return var = 0 instead.
    inv_dof = jnp.float32(1.0 / max(hw - 1, 1))

    c_mean = jnp.sum(c, axis=-1, keepdims=True) * inv_hw
    s_mean = jnp.sum(s, axis=-1, keepdims=True) * inv_hw

    # Centered variance ("two passes" over data already resident in VMEM):
    # one HBM read, better numerics than E[x^2]-E[x]^2, matches jnp/torch.var.
    c_cent = c - c_mean
    s_cent = s - s_mean
    c_var = jnp.sum(c_cent * c_cent, axis=-1, keepdims=True) * inv_dof
    s_var = jnp.sum(s_cent * s_cent, axis=-1, keepdims=True) * inv_dof

    # Fold normalize + restyle into a single per-element mul + add.
    scale = jnp.sqrt(s_var + eps) * lax.rsqrt(c_var + eps)   # (rows, 1)
    o_ref[...] = (c_cent * scale + s_mean).astype(o_ref.dtype)


def _adain_jax(content_feat, style_feat, eps=1e-5):
    """Plain-JAX path (also the test reference).  Mirrors the PyTorch module."""
    def mean_std(x):
        n, c, h, w = x.shape
        flat = x.reshape(n, c, h * w).astype(jnp.float32)
        mean = jnp.mean(flat, axis=2)
        var = jnp.var(flat, axis=2, ddof=1)  # unbiased, like torch.var
        std = jnp.sqrt(var + eps)
        return mean[:, :, None, None], std[:, :, None, None]

    c_mean, c_std = mean_std(content_feat)
    s_mean, s_std = mean_std(style_feat)
    normalized = (content_feat.astype(jnp.float32) - c_mean) / c_std
    return (normalized * s_std + s_mean).astype(content_feat.dtype)


def _vmem_estimate(row_tile: int, hw: int, itemsize: int) -> int:
    """2 inputs + 1 output, double-buffered, plus f32 kernel temps."""
    pipeline = 6 * row_tile * hw * itemsize
    temps = 5 * row_tile * hw * 4          # f32 intermediates inside the body
    return pipeline + temps + (4 << 20)    # headroom for Mosaic internals


def adain(content_feat: jax.Array, style_feat: jax.Array, eps: float = 1e-5,
          *, row_tile: int | None = None) -> jax.Array:
    """AdaIN forward. content_feat/style_feat: (N, C, H, W), same shape."""
    assert content_feat.shape == style_feat.shape
    n, c, h, w = content_feat.shape
    rows = n * c
    hw = h * w
    itemsize = jnp.dtype(content_feat.dtype).itemsize

    # hw-dominant shapes: even the minimum (8-row) block would blow VMEM.
    # TODO(synk): split the lane axis over a second ("arbitrary") grid axis with
    # stats accumulated in scratch + a finalize pass instead of falling back.
    min_tile = rows if rows < 8 else 8
    if _vmem_estimate(min_tile, hw, itemsize) > _VMEM_LIMIT_CAP:
        return _adain_jax(content_feat, style_feat, eps)

    # Contiguous (free) reshape to (rows, hw): no pad, no copy, no final slice.
    c2d = content_feat.reshape(rows, hw)
    s2d = style_feat.reshape(rows, hw)

    if row_tile is None:
        if rows < 8:
            # Block row dim equal to the full (sub-8) row extent is legal.
            row_tile = rows
        else:
            # Largest tile that still yields >= _MIN_GRID_STEPS grid steps when
            # rows allow (megacore + pipelining), capped so one f32-equivalent
            # buffer stays at ~_TARGET_BLOCK_BYTES (HBM-roofline plateau).
            tile_for_steps = max(8, (rows // _MIN_GRID_STEPS) // 8 * 8)
            tile_for_vmem = max(8, (_TARGET_BLOCK_BYTES // (hw * 4)) // 8 * 8)
            row_tile = min(tile_for_steps, tile_for_vmem)
            row_tile = min(row_tile, ((rows + 7) // 8) * 8)

    vmem_limit = int(min(max(_vmem_estimate(row_tile, hw, itemsize), 16 << 20),
                         _VMEM_LIMIT_CAP))

    grid = (pl.cdiv(rows, row_tile),)
    kernel = functools.partial(_adain_kernel, eps=eps, hw=hw)

    out2d = pl.pallas_call(
        kernel,
        out_shape=jax.ShapeDtypeStruct((rows, hw), content_feat.dtype),
        grid_spec=pltpu.PrefetchScalarGridSpec(
            num_scalar_prefetch=0,
            grid=grid,
            in_specs=[
                pl.BlockSpec((row_tile, hw), lambda i: (i, 0)),
                pl.BlockSpec((row_tile, hw), lambda i: (i, 0)),
            ],
            out_specs=pl.BlockSpec((row_tile, hw), lambda i: (i, 0)),
        ),
        compiler_params=pltpu.CompilerParams(
            dimension_semantics=("parallel",),
            vmem_limit_bytes=vmem_limit),
    )(c2d, s2d)

    return out2d.reshape(n, c, h, w)


if __name__ == "__main__":
    key = jax.random.PRNGKey(0)
    k_c, k_s = jax.random.split(key)

    # (N, C, H, W) as the module implies (VGG-style feature maps), kept small.
    content = jax.random.normal(k_c, (2, 4, 16, 16), dtype=jnp.float32)
    style = 2.0 * jax.random.normal(k_s, (2, 4, 16, 16), dtype=jnp.float32) + 0.5

    out = jax.block_until_ready(adain(content, style))
    ref = _adain_jax(content, style)
    assert out.shape == ref.shape
    assert jnp.allclose(out, ref, atol=1e-4, rtol=1e-4), "mismatch vs reference"

    # Non-128-multiple spatial size (14x14 -> hw=196) + ragged row count (12).
    c2 = jax.random.normal(k_c, (3, 4, 14, 14), dtype=jnp.float32)
    s2 = 1.5 * jax.random.normal(k_s, (3, 4, 14, 14), dtype=jnp.float32) - 0.25
    out2 = jax.block_until_ready(adain(c2, s2))
    assert jnp.allclose(out2, _adain_jax(c2, s2), atol=1e-4, rtol=1e-4), \
        "mismatch vs reference (ragged/non-128 case)"

    # Fewer than 8 rows (block row dim == full row extent path).
    c3 = jax.random.normal(k_c, (1, 3, 16, 16), dtype=jnp.float32)
    s3 = jax.random.normal(k_s, (1, 3, 16, 16), dtype=jnp.float32) + 1.0
    out3 = jax.block_until_ready(adain(c3, s3))
    assert jnp.allclose(out3, _adain_jax(c3, s3), atol=1e-4, rtol=1e-4), \
        "mismatch vs reference (rows < 8 case)"

    # bf16 inputs (stats still accumulated in f32 inside the kernel).
    cb = jax.random.normal(k_c, (2, 4, 16, 16), dtype=jnp.bfloat16)
    sb = jax.random.normal(k_s, (2, 4, 16, 16), dtype=jnp.bfloat16) * 2.0
    outb = jax.block_until_ready(adain(cb, sb))
    assert jnp.allclose(outb.astype(jnp.float32),
                        _adain_jax(cb, sb).astype(jnp.float32),
                        atol=5e-2, rtol=5e-2), "mismatch vs reference (bf16)"

    print("KERNEL_OK")
</pallas_src>

<mosaic_0001>
module attributes {stable_mosaic.version = 11 : i64} {
  func.func @_adain_kernel(%arg0: i32, %arg1: memref<8x256xf32, #tpu.memory_space<vmem>>, %arg2: memref<8x256xf32, #tpu.memory_space<vmem>>, %arg3: memref<8x256xf32, #tpu.memory_space<vmem>>) attributes {dimension_semantics = [#tpu.dimension_semantics<parallel>], iteration_bounds = array<i64: 1>, scalar_prefetch = 0 : i64, scratch_operands = 0 : i64, tpu.core_type = #tpu.core_type<tc>, window_params = [{transform_indices = @transform_0, window_bounds = array<i64: 8, 256>}, {transform_indices = @transform_1, window_bounds = array<i64: 8, 256>}, {transform_indices = @transform_2, window_bounds = array<i64: 8, 256>}]} {
    %c0 = arith.constant 0 : index
    %c0_0 = arith.constant 0 : index
    %0 = vector.load %arg1[%c0, %c0_0] : memref<8x256xf32, #tpu.memory_space<vmem>>, vector<8x256xf32>
    %c0_1 = arith.constant 0 : index
    %c0_2 = arith.constant 0 : index
    %1 = vector.load %arg2[%c0_1, %c0_2] : memref<8x256xf32, #tpu.memory_space<vmem>>, vector<8x256xf32>
    %cst = arith.constant dense<0.000000e+00> : vector<8xf32>
    %2 = vector.multi_reduction <add>, %0, %cst [1] : vector<8x256xf32> to vector<8xf32>
    %3 = vector.shape_cast %2 : vector<8xf32> to vector<8x1xf32>
    %cst_3 = arith.constant 3.906250e-03 : f32
    %4 = vector.broadcast %cst_3 : f32 to vector<8x1xf32>
    %5 = arith.mulf %3, %4 : vector<8x1xf32>
    %cst_4 = arith.constant dense<0.000000e+00> : vector<8xf32>
    %6 = vector.multi_reduction <add>, %1, %cst_4 [1] : vector<8x256xf32> to vector<8xf32>
    %7 = vector.shape_cast %6 : vector<8xf32> to vector<8x1xf32>
    %cst_5 = arith.constant 3.906250e-03 : f32
    %8 = vector.broadcast %cst_5 : f32 to vector<8x1xf32>
    %9 = arith.mulf %7, %8 : vector<8x1xf32>
    %10 = vector.broadcast %5 : vector<8x1xf32> to vector<8x256xf32>
    %11 = arith.subf %0, %10 : vector<8x256xf32>
    %12 = vector.broadcast %9 : vector<8x1xf32> to vector<8x256xf32>
    %13 = arith.subf %1, %12 : vector<8x256xf32>
    %14 = arith.mulf %11, %11 : vector<8x256xf32>
    %cst_6 = arith.constant dense<0.000000e+00> : vector<8xf32>
    %15 = vector.multi_reduction <add>, %14, %cst_6 [1] : vector<8x256xf32> to vector<8xf32>
    %16 = vector.shape_cast %15 : vector<8xf32> to vector<8x1xf32>
    %cst_7 = arith.constant 0.00392156886 : f32
    %17 = vector.broadcast %cst_7 : f32 to vector<8x1xf32>
    %18 = arith.mulf %16, %17 : vector<8x1xf32>
    %19 = arith.mulf %13, %13 : vector<8x256xf32>
    %cst_8 = arith.constant dense<0.000000e+00> : vector<8xf32>
    %20 = vector.multi_reduction <add>, %19, %cst_8 [1] : vector<8x256xf32> to vector<8xf32>
    %21 = vector.shape_cast %20 : vector<8xf32> to vector<8x1xf32>
    %cst_9 = arith.constant 0.00392156886 : f32
    %22 = vector.broadcast %cst_9 : f32 to vector<8x1xf32>
    %23 = arith.mulf %21, %22 : vector<8x1xf32>
    %cst_10 = arith.constant 9.99999974E-6 : f32
    %24 = vector.broadcast %cst_10 : f32 to vector<8x1xf32>
    %25 = arith.addf %23, %24 : vector<8x1xf32>
    %26 = math.sqrt %25 : vector<8x1xf32>
    %cst_11 = arith.constant 9.99999974E-6 : f32
    %27 = vector.broadcast %cst_11 : f32 to vector<8x1xf32>
    %28 = arith.addf %18, %27 : vector<8x1xf32>
    %29 = math.rsqrt %28 : vector<8x1xf32>
    %30 = arith.mulf %26, %29 : vector<8x1xf32>
    %31 = vector.broadcast %30 : vector<8x1xf32> to vector<8x256xf32>
    %32 = arith.mulf %11, %31 : vector<8x256xf32>
    %33 = vector.broadcast %9 : vector<8x1xf32> to vector<8x256xf32>
    %34 = arith.addf %32, %33 : vector<8x256xf32>
    %c0_12 = arith.constant 0 : index
    %c0_13 = arith.constant 0 : index
    %35 = vector.load %arg3[%c0_12, %c0_13] : memref<8x256xf32, #tpu.memory_space<vmem>>, vector<8x256xf32>
    tpu.vector_store %arg3[%c0_12, %c0_13], %34 {strides = array<i32>} : memref<8x256xf32, #tpu.memory_space<vmem>>, vector<8x256xf32>,
    return
  }
  func.func @transform_0(%arg0: i32) -> (i32, i32) {
    %c0_i32 = arith.constant 0 : i32
    %c0_i32_0 = arith.constant 0 : i32
    return %arg0, %c0_i32 : i32, i32
  }
  func.func @transform_1(%arg0: i32) -> (i32, i32) {
    %c0_i32 = arith.constant 0 : i32
    %c0_i32_0 = arith.constant 0 : i32
    return %arg0, %c0_i32 : i32, i32
  }
  func.func @transform_2(%arg0: i32) -> (i32, i32) {
    %c0_i32 = arith.constant 0 : i32
    %c0_i32_0 = arith.constant 0 : i32
    return %arg0, %c0_i32 : i32, i32
  }
}

</mosaic_0001>

<bundles_post_ra>
// kernel: tpu_custom_call.1
= control target key start
LH: loop header
LB: loop body
LE: loop exit
PB: predicated region body
PF: predicated region fallthrough
CT: control target
= control target key end

     0   :  { %7 = vsyncpa [#allocation3], 0  ;;  %s230_s0 = inlined_call_operand.hbm [shape: f32[8,256], index: 0, kind: input, shape index: {}]   ;;  %s231_s1 = inlined_call_operand.hbm [shape: f32[8,256], index: 1, kind: input, shape index: {}]   ;;  %s232_s2 = inlined_call_operand.hbm [shape: f32[8,256], index: 2, kind: output, shape index: {}]  }
   0x1   :  { %8 = vsyncpa [#allocation6], 0 }
   0x2   :  { %9 = vsyncpa [#allocation4], 0  ;;  %s176_s9 = smov [#allocation2]   ;;  %s177_s11 = smov [#allocation5]  }
   0x3   :  { %s16_s10 = sshll.u32 %s176_s9, 4  ;;  %s26_s12 = sshll.u32 %s177_s11, 4  ;;  %s17_s10 = int_to_ptr.vmem [resolvable:$true] %s16_s10  ;;  %s27_s12 = int_to_ptr.vmem [resolvable:$true] %s26_s12 }
   0x4   :  { %s104_s15 = scalar_lea.hbm %s230_s0, 256 }
   0x5   :  { %p105_p0 = scmp.ne.s32.totalorder %s230_s0, %s104_s15  ;;  %p108_p1 = scmp.lt.u32.totalorder %s104_s15, %s230_s0 }
   0x7   :  { %p110_p2 = pnand %p108_p1, %p105_p0 }
   0x9   :  { %113 = shalt.err (!%p110_p2)
}
   0xa   :  { %s114_s20 = scalar_lea.vmem %s17_s10, 256  ;;  %p119_p4 = scmp.lt.s32.totalorder %s17_s10, %s17_s10 }
   0xb   :  { %p115_p3 = scmp.ne.s32.totalorder %s17_s10, %s114_s20  ;;  %p120_p5 = scmp.lt.s32.totalorder %s114_s20, %s114_s20 }
   0xd   :  { %p121_p6 = por %p120_p5, %p119_p4 }
   0xf   :  { %p122_p7 = pnand %p121_p6, %p115_p3 }
  0x11   :  { %125 = shalt.err (!%p122_p7)
}
  0x12   :  { %19 = dma.hbm_to_vmem [thread:$0]  %s230_s0, 256, %s17_s10, [#allocation3]  }
  0x13   :  { %s126_s25 = scalar_lea.hbm %s231_s1, 256 }
  0x14   :  { %p127_p8 = scmp.ne.s32.totalorder %s231_s1, %s126_s25  ;;  %p130_p9 = scmp.lt.u32.totalorder %s126_s25, %s231_s1 }
  0x16   :  { %p132_p10 = pnand %p130_p9, %p127_p8 }
  0x18   :  { %135 = shalt.err (!%p132_p10)
}
  0x19   :  { %s136_s30 = scalar_lea.vmem %s27_s12, 256  ;;  %p141_p12 = scmp.lt.s32.totalorder %s27_s12, %s27_s12 }
  0x1a   :  { %p137_p11 = scmp.ne.s32.totalorder %s27_s12, %s136_s30  ;;  %p142_p13 = scmp.lt.s32.totalorder %s136_s30, %s136_s30 }
  0x1c   :  { %p143_p0 = por %p142_p13, %p141_p12 }
  0x1e   :  { %p144_p1 = pnand %p143_p0, %p137_p11 }
  0x20   :  { %147 = shalt.err (!%p144_p1)
}
  0x21   :  { %29 = dma.hbm_to_vmem [thread:$0]  %s231_s1, 256, %s27_s12, [#allocation6]  }
  0x22   :  { %170 = dma.done.wait [#allocation3], 256  }
  0x23   :  { %171 = vsyncadd [#allocation3], 4294967040 }
  0x24   :  { %172 = dma.done.wait [#allocation6], 256  }
  0x25   :  { %173 = vsyncadd [#allocation6], 4294967040  ;;  %v38_v0 = vld [vmem:[#allocation5] sm:$0xff]  ;;  %v39_v1 = vld [vmem:[#allocation5 + $0x8] sm:$0xff]  ;;  %s178_s1 = smov [#allocation7]  }
  0x26   :  { %v36_v2 = vld [vmem:[#allocation2] sm:$0xff]  ;;  %v44_v3 = vadd.f32 %v39_v1, %v38_v0  ;;  %v37_v4 = vld [vmem:[#allocation2 + $0x8] sm:$0xff]  ;;  %s87_s4 = sshll.u32 %s178_s1, 4  ;;  %s88_s4 = int_to_ptr.vmem [resolvable:$true] %s87_s4 }
  0x27   :  { %v40_v5 = vadd.f32 %v37_v4, %v36_v2  ;;  %s148_s5 = scalar_lea.vmem %s88_s4, 256  ;;  %p153_p3 = scmp.lt.s32.totalorder %s88_s4, %s88_s4 }
  0x28   :  { %45 = vadd.xlane.f32.xlu0 %v44_v3  ;;  %p149_p2 = scmp.ne.s32.totalorder %s88_s4, %s148_s5  ;;  %p154_p4 = scmp.lt.s32.totalorder %s148_s5, %s148_s5 }
  0x2a   :  { %p155_p5 = por %p154_p4, %p153_p3 }
  0x2c   :  { %41 = vadd.xlane.f32.xlu0 %v40_v5  ;;  %p156_p6 = pnand %p155_p5, %p149_p2 }
  0xb5   :  { %v46_v6 = vpop.xlane.xlu0 %45 }
  0xb6   :  { %v47_v7 = vmul.f32 0.00390625, %v46_v6 }
  0xb8   :  { %v50_v8 = vsub.f32 %v38_v0, %v47_v7  ;;  %v51_v9 = vsub.f32 %v39_v1, %v47_v7 }
  0xb9   :  { %v42_v10 = vpop.xlane.xlu0 %41 }
  0xba   :  { %v43_v11 = vmul.f32 0.00390625, %v42_v10  ;;  %v58_v12 = vmul.f32 %v50_v8, %v50_v8  ;;  %v59_v13 = vmul.f32 %v51_v9, %v51_v9 }
  0xbc   :  { %v48_v14 = vsub.f32 %v36_v2, %v43_v11  ;;  %v49_v15 = vsub.f32 %v37_v4, %v43_v11  ;;  %v60_v16 = vadd.f32 %v59_v13, %v58_v12 }
  0xbe   :  { %61 = vadd.xlane.f32.xlu1 %v60_v16  ;;  %v52_v17 = vmul.f32 %v48_v14, %v48_v14  ;;  %v53_v18 = vmul.f32 %v49_v15, %v49_v15 }
  0xc0   :  { %v54_v19 = vadd.f32 %v53_v18, %v52_v17 }
  0xc2   :  { %55 = vadd.xlane.f32.xlu1 %v54_v19 }
 0x14b   :  { %v62_v20 = vpop.xlane.xlu1 %61 }
 0x14c   :  { %v63_v21 = vmul.f32 0.003921569, %v62_v20 }
 0x14e   :  { %v64_v22 = vadd.f32 1e-05, %v63_v21 }
 0x14f   :  { %v56_v23 = vpop.xlane.xlu1 %55 }
 0x150   :  { %100 = vrsqrt.f32 %v64_v22  ;;  %v57_v24 = vmul.f32 0.003921569, %v56_v23  ;;  %vm67_vm0 = vcmp.eq.f32.partialorder %v64_v22, inf  ;;  %v70_v28 = vand.u32 2147483648, %v64_v22 }
 0x151   :  { %vm69_vm1 = vcmp.eq.f32.partialorder %v64_v22, 0.0 }
 0x152   :  { %v72_v25 = vadd.f32 1e-05, %v57_v24 }
 0x154   :  { %102 = vrsqrt.f32 %v72_v25 }
 0x15a   :  { %v101_v26 = vpop.eup %100 }
 0x15b   :  { %v66_v27 = vmul.f32 %v101_v26, %v64_v22 }
 0x15d   :  { %v68_v29 = vsel %vm67_vm0, %v64_v22, %v66_v27 }
 0x15e   :  { %v103_v30 = vpop.eup %102  ;;  %v71_v31 = vsel %vm69_vm1, %v70_v28, %v68_v29 }
 0x15f   :  { %v74_v32 = vmul.f32 %v103_v30, %v71_v31 }
 0x161   :  { %v75_v33 = vmul.f32 %v74_v32, %v48_v14  ;;  %v76_v34 = vmul.f32 %v74_v32, %v49_v15 }
 0x163   :  { %v77_v35 = vadd.f32 %v75_v33, %v47_v7  ;;  %v78_v36 = vadd.f32 %v76_v34, %v47_v7 }
 0x165   :  { %79 = vst [vmem:[#allocation7] sm:$0xff] %v77_v35  ;;  %80 = vst [vmem:[#allocation7 + $0x8] sm:$0xff] %v78_v36 }
 0x166   :  { %159 = shalt.err (!%p156_p6)
}
 0x167   :  { %s160_s8 = scalar_lea.hbm %s232_s2, 256 }
 0x168   :  { %p161_p7 = scmp.ne.s32.totalorder %s232_s2, %s160_s8  ;;  %p164_p8 = scmp.lt.u32.totalorder %s160_s8, %s232_s2 }
 0x16a   :  { %p166_p9 = pnand %p164_p8, %p161_p7 }
 0x16c   :  { %169 = shalt.err (!%p166_p9)
}
 0x16d   :  { %90 = dma.vmem_to_hbm [thread:$0]  %s88_s4, 256, %s232_s2, [#allocation4]  }
 0x16e   :  { %174 = dma.done.wait [#allocation4], 256  }
 0x16f   :  { %175 = vsyncadd [#allocation4], 4294967040 }
 0x170   :  { %94 = vsyncpa [#allocation3], 1 }
 0x171   :  { %95 = vsyncpa [#allocation6], 1 }
 0x172   :  { %96 = vsyncpa [#allocation4], 1 }

</bundles_post_ra>
